<compile_context>
chip_gen: v7x
topology: tpu7x:2x2x1
jax: 0.10.0
libtpu: 0.0.40
codegen_flags: <defaults>
</compile_context>

<pallas_src>
import functools

import jax
import jax.numpy as jnp
from jax import lax
from jax.experimental import pallas as pl
from jax.experimental.pallas import tpu as pltpu

CPAD = 128       # lane-dense channel padding for conv-block outputs
HPAD = 128       # lane-dense padding for the fused-heads output slab
TR_MAX = 256     # row tile for the conv blocks at large sizes


def _round_up(n, m):
    return ((n + m - 1) // m) * m


def _full_spec(shape):
    n = len(shape)
    return pl.BlockSpec(shape, lambda i, _n=n: (0,) * _n)


def _block_diag(mats):
    rows = sum(m.shape[0] for m in mats)
    cols = sum(m.shape[1] for m in mats)
    out = jnp.zeros((rows, cols), mats[0].dtype)
    r = c = 0
    for m in mats:
        out = out.at[r:r + m.shape[0], c:c + m.shape[1]].set(m)
        r += m.shape[0]
        c += m.shape[1]
    return out


# ---------------------------------------------------------------------------
# Pallas kernels
# ---------------------------------------------------------------------------
def conv_block_kernel(patches_ref, w_ref, scale_ref, shift_ref, out_ref, *, pool):
    """Fused Conv1d(stride=2, no bias) -> ReLU -> BatchNorm(eval) -> MaxPool(stride=2).

    patches_ref: (TR, pool*Cin*K) bf16 -- the `pool` conv windows side by side in lanes
    w_ref:       (pool*Cin*K, pool*CPAD) bf16 block-diagonal conv weight (chan-padded)
    scale_ref:   (1, pool*CPAD) f32  BN scale (gamma/sqrt(var+eps)), tiled per window
    shift_ref:   (1, pool*CPAD) f32  BN shift (beta - mean*scale),   tiled per window
    out_ref:     (TR, CPAD)     f32  max over the pool windows (lane-dense store)
    """
    z = jnp.dot(patches_ref[...], w_ref[...], preferred_element_type=jnp.float32)
    z = jnp.maximum(z, 0.0)                      # ReLU (module order: Conv -> ReLU -> BN)
    z = z * scale_ref[...] + shift_ref[...]      # BatchNorm1d in eval mode
    acc = z[:, 0:CPAD]
    for j in range(1, pool):                     # MaxPool over aligned 128-lane groups
        acc = jnp.maximum(acc, z[:, j * CPAD:(j + 1) * CPAD])
    out_ref[...] = acc


def heads_kernel(f_ref, w1_ref, b1_ref, w2_ref, b2_ref, w3_ref, b3_ref, out_ref):
    """Three fused heads: Linear -> ReLU -> (Dropout=id) -> Linear -> Linear -> Sigmoid."""
    h = jnp.dot(f_ref[...], w1_ref[...], preferred_element_type=jnp.float32) + b1_ref[...]
    h = jnp.maximum(h, 0.0)
    h = jnp.dot(h.astype(jnp.bfloat16), w2_ref[...],
                preferred_element_type=jnp.float32) + b2_ref[...]
    h = jnp.dot(h.astype(jnp.bfloat16), w3_ref[...],
                preferred_element_type=jnp.float32) + b3_ref[...]
    out_ref[...] = 1.0 / (1.0 + jnp.exp(-h))     # Sigmoid (f32 epilogue)


# ---------------------------------------------------------------------------
# pallas_call wrappers
# ---------------------------------------------------------------------------
def _extract_pool_patches(x_nlc, K, pool):
    """x_nlc: (B, L, Cin) -> (B*Lp, pool*Cin*K) patches.

    Input index used by pool window j, conv tap k at pooled position lp is
    4*lp + 2*j + k (Conv1d stride 2 composed with MaxPool1d(kernel=pool, stride=2),
    exactly as in the module, which sets pool stride=2 explicitly).
    Built from strided slices + stack/concat only -- no gather, no big transpose.
    """
    B, L, Cin = x_nlc.shape
    Lc = (L - K) // 2 + 1
    Lp = (Lc - pool) // 2 + 1
    groups = []
    for j in range(pool):
        taps = []
        for k in range(K):
            start = 2 * j + k
            limit = start + 4 * (Lp - 1) + 1
            taps.append(lax.slice_in_dim(x_nlc, start, limit, stride=4, axis=1))
        # (B, Lp, Cin, K) -> (B, Lp, Cin*K): ci-major/k-minor, matching w.reshape(Cout, Cin*K)
        groups.append(jnp.stack(taps, axis=-1).reshape(B, Lp, Cin * K))
    patches = jnp.concatenate(groups, axis=-1)                 # (B, Lp, pool*Cin*K)
    return patches.reshape(B * Lp, pool * Cin * K), Lp


def conv_block(x_nlc, w_conv, bn_g, bn_b, bn_m, bn_v, pool, eps=1e-5):
    """One feature-extractor block. x_nlc: (B, L, Cin) -> (B, Lp, Cout) in NLC layout."""
    B, L, Cin = x_nlc.shape
    Cout, _, K = w_conv.shape
    patches, Lp = _extract_pool_patches(x_nlc, K, pool)
    R = B * Lp
    Kdim = pool * Cin * K

    # Block-diagonal conv weight; channels zero-padded to CPAD lanes per pool window.
    w2d = jnp.transpose(w_conv.reshape(Cout, Cin * K))                  # (Cin*K, Cout)
    w_pad = jnp.zeros((Cin * K, CPAD), w2d.dtype).at[:, :Cout].set(w2d)
    w_bd = _block_diag([w_pad] * pool)                                  # (Kdim, pool*CPAD)

    # BN folded to scale/shift; padded channels get scale=shift=0 so they stay exactly 0
    # and can never leak into the feature vector (they are sliced off below anyway).
    inv = bn_g / jnp.sqrt(bn_v + eps)
    scale = jnp.zeros((CPAD,), jnp.float32).at[:Cout].set(inv)
    shift = jnp.zeros((CPAD,), jnp.float32).at[:Cout].set(bn_b - bn_m * inv)
    scale_t = jnp.tile(scale, pool).reshape(1, pool * CPAD)
    shift_t = jnp.tile(shift, pool).reshape(1, pool * CPAD)

    # Row tiling: single full block at small sizes, 256-row "parallel" tiles at scale.
    TR = _round_up(R, 8) if R <= TR_MAX else TR_MAX
    R_pad = _round_up(R, TR)
    if R_pad != R:
        patches = jnp.pad(patches, ((0, R_pad - R), (0, 0)))

    out = pl.pallas_call(
        functools.partial(conv_block_kernel, pool=pool),
        grid=(R_pad // TR,),
        in_specs=[
            pl.BlockSpec((TR, Kdim), lambda i: (i, 0)),
            _full_spec((Kdim, pool * CPAD)),
            _full_spec((1, pool * CPAD)),
            _full_spec((1, pool * CPAD)),
        ],
        out_specs=pl.BlockSpec((TR, CPAD), lambda i: (i, 0)),
        out_shape=jax.ShapeDtypeStruct((R_pad, CPAD), jnp.float32),
        compiler_params=pltpu.CompilerParams(dimension_semantics=("parallel",)),
    )(patches.astype(jnp.bfloat16), w_bd.astype(jnp.bfloat16), scale_t, shift_t)

    return out[:R, :Cout].reshape(B, Lp, Cout)                 # stay in NLC


def fused_heads(feats, task_p, domain_p, r01b_p):
    """All three heads in one pallas_call. Returns (rows, 3): [task, domain, r01b]."""
    Rh, F = feats.shape
    heads = (task_p, domain_p, r01b_p)
    W1 = jnp.concatenate([h[0] for h in heads], axis=1)        # (F, 3*fc1)
    b1 = jnp.concatenate([h[1] for h in heads]).reshape(1, -1)
    W2 = _block_diag([h[2] for h in heads])                    # (3*fc1, 3*fc2)
    b2 = jnp.concatenate([h[3] for h in heads]).reshape(1, -1)
    W3 = _block_diag([h[4] for h in heads])                    # (3*fc2, 3)
    b3 = jnp.concatenate([h[5] for h in heads])                # (3,)
    W3p = jnp.zeros((W3.shape[0], HPAD), W3.dtype).at[:, :3].set(W3)
    b3p = jnp.zeros((1, HPAD), jnp.float32).at[0, :3].set(b3)

    R_pad = _round_up(Rh, 8)
    f = feats if R_pad == Rh else jnp.pad(feats, ((0, R_pad - Rh), (0, 0)))

    out = pl.pallas_call(
        heads_kernel,
        grid=(1,),
        in_specs=[_full_spec((R_pad, F)),
                  _full_spec(W1.shape), _full_spec(b1.shape),
                  _full_spec(W2.shape), _full_spec(b2.shape),
                  _full_spec(W3p.shape), _full_spec(b3p.shape)],
        out_specs=_full_spec((R_pad, HPAD)),
        out_shape=jax.ShapeDtypeStruct((R_pad, HPAD), jnp.float32),
    )(f.astype(jnp.bfloat16), W1.astype(jnp.bfloat16), b1,
      W2.astype(jnp.bfloat16), b2, W3p.astype(jnp.bfloat16), b3p)
    return out[:Rh, :3]


def feature_extractor(x_ncl, params, pool1, pool2):
    x_nlc = jnp.transpose(x_ncl, (0, 2, 1))                    # NCL -> NLC (Cin=1: trivial)
    h = conv_block(x_nlc, params["conv1_w"], params["bn1_g"], params["bn1_b"],
                   params["bn1_m"], params["bn1_v"], pool1)
    h = conv_block(h, params["conv2_w"], params["bn2_g"], params["bn2_b"],
                   params["bn2_m"], params["bn2_v"], pool2)
    B = h.shape[0]
    # PyTorch .view(B, -1) flattens the NCL tensor channel-major.
    return jnp.transpose(h, (0, 2, 1)).reshape(B, -1)


def dann_1d_forward(x, y, alpha, params, *, pool1, pool2):
    del alpha  # gradient reversal (ReverseLayerF) is the identity in the forward pass
    B = x.shape[0]
    x_all = x if y is None else jnp.concatenate([x, y], axis=0)
    feats = feature_extractor(x_all, params, pool1, pool2)     # single pass for x (and y)
    outs = fused_heads(feats, params["task"], params["domain"], params["r01b"])
    task_output = outs[:B, 0]
    domain_output = outs[:B, 1]
    r01b_output = outs[B:, 2] if y is not None else None
    return task_output, domain_output, r01b_output


# ---------------------------------------------------------------------------
# Deterministic parameter construction + demo
# ---------------------------------------------------------------------------
def make_params(key, *, input_size, out1, out2, conv1, pool1, conv2, pool2, fc1, fc2):
    ks = jax.random.split(key, 8)
    # feature-extractor output length (mirrors _get_fc_input_size)
    lc1 = (input_size - conv1) // 2 + 1
    lp1 = (lc1 - pool1) // 2 + 1
    lc2 = (lp1 - conv2) // 2 + 1
    lp2 = (lc2 - pool2) // 2 + 1
    fc_input_size = out2 * lp2

    def lin(kw, fan_in, fan_out):
        w = jax.random.normal(kw, (fan_in, fan_out), jnp.float32) * (1.0 / jnp.sqrt(fan_in))
        b = jnp.zeros((fan_out,), jnp.float32)
        return w, b

    def head(k):
        k1, k2, k3 = jax.random.split(k, 3)
        W1, b1 = lin(k1, fc_input_size, fc1)
        W2, b2 = lin(k2, fc1, fc2)
        W3, b3 = lin(k3, fc2, 1)
        return (W1, b1, W2, b2, W3, b3)

    params = dict(
        conv1_w=jax.random.normal(ks[0], (out1, 1, conv1), jnp.float32) * 0.3,
        conv2_w=jax.random.normal(ks[1], (out2, out1, conv2), jnp.float32) * 0.3,
        bn1_g=jnp.ones((out1,), jnp.float32), bn1_b=jnp.zeros((out1,), jnp.float32),
        bn1_m=jnp.zeros((out1,), jnp.float32), bn1_v=jnp.ones((out1,), jnp.float32),
        bn2_g=jnp.ones((out2,), jnp.float32), bn2_b=jnp.zeros((out2,), jnp.float32),
        bn2_m=jnp.zeros((out2,), jnp.float32), bn2_v=jnp.ones((out2,), jnp.float32),
        task=head(ks[2]), domain=head(ks[3]), r01b=head(ks[4]),
    )
    return params, fc_input_size


if __name__ == "__main__":
    # Small deterministic config (module hyper-parameters)
    cfg = dict(input_size=64, out1=4, out2=8, conv1=5, pool1=2, conv2=3, pool2=2,
               fc1=32, fc2=16)
    key = jax.random.PRNGKey(0)
    kp, kx, ky = jax.random.split(key, 3)
    params, fc_in = make_params(kp, **cfg)

    B = 2
    x = jax.random.normal(kx, (B, 1, cfg["input_size"]), jnp.float32)  # NCL, like PyTorch
    y = jax.random.normal(ky, (B, 1, cfg["input_size"]), jnp.float32)
    alpha = 0.5  # only affects the backward pass (gradient reversal)

    fwd = jax.jit(functools.partial(dann_1d_forward,
                                    pool1=cfg["pool1"], pool2=cfg["pool2"]))
    task_out, domain_out, r01b_out = fwd(x, y, alpha, params)
    jax.block_until_ready((task_out, domain_out, r01b_out))

    assert task_out.shape == (B,) and domain_out.shape == (B,) and r01b_out.shape == (B,)
    assert bool(jnp.all(jnp.isfinite(task_out)))
    assert bool(jnp.all(jnp.isfinite(domain_out)))
    assert bool(jnp.all(jnp.isfinite(r01b_out)))
    print("KERNEL_OK")
</pallas_src>

<mosaic_0001>
module attributes {stable_mosaic.version = 11 : i64} {
  func.func @conv_block_kernel(%arg0: i32, %arg1: memref<64x10xbf16, #tpu.memory_space<vmem>>, %arg2: memref<10x256xbf16, #tpu.memory_space<vmem>>, %arg3: memref<1x256xf32, #tpu.memory_space<vmem>>, %arg4: memref<1x256xf32, #tpu.memory_space<vmem>>, %arg5: memref<64x128xf32, #tpu.memory_space<vmem>>) attributes {dimension_semantics = [#tpu.dimension_semantics<parallel>], iteration_bounds = array<i64: 1>, scalar_prefetch = 0 : i64, scratch_operands = 0 : i64, tpu.core_type = #tpu.core_type<tc>, window_params = [{transform_indices = @transform_0, window_bounds = array<i64: 64, 10>}, {pipeline_mode = #tpu.pipeline_mode<synchronous>, transform_indices = @transform_1, window_bounds = array<i64: 10, 256>}, {pipeline_mode = #tpu.pipeline_mode<synchronous>, transform_indices = @transform_2, window_bounds = array<i64: 1, 256>}, {pipeline_mode = #tpu.pipeline_mode<synchronous>, transform_indices = @transform_3, window_bounds = array<i64: 1, 256>}, {transform_indices = @transform_4, window_bounds = array<i64: 64, 128>}]} {
    %c0 = arith.constant 0 : index
    %c0_0 = arith.constant 0 : index
    %0 = vector.load %arg1[%c0, %c0_0] : memref<64x10xbf16, #tpu.memory_space<vmem>>, vector<64x10xbf16>
    %c0_1 = arith.constant 0 : index
    %c0_2 = arith.constant 0 : index
    %1 = vector.load %arg2[%c0_1, %c0_2] : memref<10x256xbf16, #tpu.memory_space<vmem>>, vector<10x256xbf16>
    %cst = arith.constant dense<0.000000e+00> : vector<64x256xf32>
    %2 = tpu.matmul %0, %1, %cst {dimension_numbers = #tpu.dot_dimension_numbers<[1], [0], [0], [1], [0, 0, 1, 1], [], []>} : vector<64x10xbf16>, vector<10x256xbf16>, vector<64x256xf32> -> vector<64x256xf32>
    %cst_3 = arith.constant 0.000000e+00 : f32
    %3 = vector.broadcast %cst_3 : f32 to vector<64x256xf32>
    %4 = arith.maximumf %2, %3 : vector<64x256xf32>
    %c0_4 = arith.constant 0 : index
    %c0_5 = arith.constant 0 : index
    %5 = vector.load %arg3[%c0_4, %c0_5] : memref<1x256xf32, #tpu.memory_space<vmem>>, vector<1x256xf32>
    %6 = vector.broadcast %5 : vector<1x256xf32> to vector<64x256xf32>
    %7 = arith.mulf %4, %6 : vector<64x256xf32>
    %c0_6 = arith.constant 0 : index
    %c0_7 = arith.constant 0 : index
    %8 = vector.load %arg4[%c0_6, %c0_7] : memref<1x256xf32, #tpu.memory_space<vmem>>, vector<1x256xf32>
    %9 = vector.broadcast %8 : vector<1x256xf32> to vector<64x256xf32>
    %10 = arith.addf %7, %9 : vector<64x256xf32>
    %11 = vector.extract_strided_slice %10 {offsets = [0, 0], sizes = [64, 128], strides = [1, 1]} : vector<64x256xf32> to vector<64x128xf32>
    %12 = vector.extract_strided_slice %10 {offsets = [0, 128], sizes = [64, 128], strides = [1, 1]} : vector<64x256xf32> to vector<64x128xf32>
    %13 = arith.maximumf %11, %12 : vector<64x128xf32>
    %c0_8 = arith.constant 0 : index
    %c0_9 = arith.constant 0 : index
    %14 = vector.load %arg5[%c0_8, %c0_9] : memref<64x128xf32, #tpu.memory_space<vmem>>, vector<64x128xf32>
    tpu.vector_store %arg5[%c0_8, %c0_9], %13 {strides = array<i32>} : memref<64x128xf32, #tpu.memory_space<vmem>>, vector<64x128xf32>,
    return
  }
  func.func @transform_0(%arg0: i32) -> (i32, i32) {
    %c0_i32 = arith.constant 0 : i32
    %c0_i32_0 = arith.constant 0 : i32
    return %arg0, %c0_i32 : i32, i32
  }
  func.func @transform_1(%arg0: i32) -> (i32, i32) {
    %c0_i32 = arith.constant 0 : i32
    %c0_i32_0 = arith.constant 0 : i32
    %c0_i32_1 = arith.constant 0 : i32
    return %c0_i32, %c0_i32_0 : i32, i32
  }
  func.func @transform_2(%arg0: i32) -> (i32, i32) {
    %c0_i32 = arith.constant 0 : i32
    %c0_i32_0 = arith.constant 0 : i32
    %c0_i32_1 = arith.constant 0 : i32
    return %c0_i32, %c0_i32_0 : i32, i32
  }
  func.func @transform_3(%arg0: i32) -> (i32, i32) {
    %c0_i32 = arith.constant 0 : i32
    %c0_i32_0 = arith.constant 0 : i32
    %c0_i32_1 = arith.constant 0 : i32
    return %c0_i32, %c0_i32_0 : i32, i32
  }
  func.func @transform_4(%arg0: i32) -> (i32, i32) {
    %c0_i32 = arith.constant 0 : i32
    %c0_i32_0 = arith.constant 0 : i32
    return %arg0, %c0_i32 : i32, i32
  }
}

module attributes {stable_mosaic.version = 11 : i64} {
  func.func @conv_block_kernel(%arg0: i32, %arg1: memref<16x24xbf16, #tpu.memory_space<vmem>>, %arg2: memref<24x256xbf16, #tpu.memory_space<vmem>>, %arg3: memref<1x256xf32, #tpu.memory_space<vmem>>, %arg4: memref<1x256xf32, #tpu.memory_space<vmem>>, %arg5: memref<16x128xf32, #tpu.memory_space<vmem>>) attributes {dimension_semantics = [#tpu.dimension_semantics<parallel>], iteration_bounds = array<i64: 1>, scalar_prefetch = 0 : i64, scratch_operands = 0 : i64, tpu.core_type = #tpu.core_type<tc>, window_params = [{transform_indices = @transform_0, window_bounds = array<i64: 16, 24>}, {pipeline_mode = #tpu.pipeline_mode<synchronous>, transform_indices = @transform_1, window_bounds = array<i64: 24, 256>}, {pipeline_mode = #tpu.pipeline_mode<synchronous>, transform_indices = @transform_2, window_bounds = array<i64: 1, 256>}, {pipeline_mode = #tpu.pipeline_mode<synchronous>, transform_indices = @transform_3, window_bounds = array<i64: 1, 256>}, {transform_indices = @transform_4, window_bounds = array<i64: 16, 128>}]} {
    %c0 = arith.constant 0 : index
    %c0_0 = arith.constant 0 : index
    %0 = vector.load %arg1[%c0, %c0_0] : memref<16x24xbf16, #tpu.memory_space<vmem>>, vector<16x24xbf16>
    %c0_1 = arith.constant 0 : index
    %c0_2 = arith.constant 0 : index
    %1 = vector.load %arg2[%c0_1, %c0_2] : memref<24x256xbf16, #tpu.memory_space<vmem>>, vector<24x256xbf16>
    %cst = arith.constant dense<0.000000e+00> : vector<16x256xf32>
    %2 = tpu.matmul %0, %1, %cst {dimension_numbers = #tpu.dot_dimension_numbers<[1], [0], [0], [1], [0, 0, 1, 1], [], []>} : vector<16x24xbf16>, vector<24x256xbf16>, vector<16x256xf32> -> vector<16x256xf32>
    %cst_3 = arith.constant 0.000000e+00 : f32
    %3 = vector.broadcast %cst_3 : f32 to vector<16x256xf32>
    %4 = arith.maximumf %2, %3 : vector<16x256xf32>
    %c0_4 = arith.constant 0 : index
    %c0_5 = arith.constant 0 : index
    %5 = vector.load %arg3[%c0_4, %c0_5] : memref<1x256xf32, #tpu.memory_space<vmem>>, vector<1x256xf32>
    %6 = vector.broadcast %5 : vector<1x256xf32> to vector<16x256xf32>
    %7 = arith.mulf %4, %6 : vector<16x256xf32>
    %c0_6 = arith.constant 0 : index
    %c0_7 = arith.constant 0 : index
    %8 = vector.load %arg4[%c0_6, %c0_7] : memref<1x256xf32, #tpu.memory_space<vmem>>, vector<1x256xf32>
    %9 = vector.broadcast %8 : vector<1x256xf32> to vector<16x256xf32>
    %10 = arith.addf %7, %9 : vector<16x256xf32>
    %11 = vector.extract_strided_slice %10 {offsets = [0, 0], sizes = [16, 128], strides = [1, 1]} : vector<16x256xf32> to vector<16x128xf32>
    %12 = vector.extract_strided_slice %10 {offsets = [0, 128], sizes = [16, 128], strides = [1, 1]} : vector<16x256xf32> to vector<16x128xf32>
    %13 = arith.maximumf %11, %12 : vector<16x128xf32>
    %c0_8 = arith.constant 0 : index
    %c0_9 = arith.constant 0 : index
    %14 = vector.load %arg5[%c0_8, %c0_9] : memref<16x128xf32, #tpu.memory_space<vmem>>, vector<16x128xf32>
    tpu.vector_store %arg5[%c0_8, %c0_9], %13 {strides = array<i32>} : memref<16x128xf32, #tpu.memory_space<vmem>>, vector<16x128xf32>,
    return
  }
  func.func @transform_0(%arg0: i32) -> (i32, i32) {
    %c0_i32 = arith.constant 0 : i32
    %c0_i32_0 = arith.constant 0 : i32
    return %arg0, %c0_i32 : i32, i32
  }
  func.func @transform_1(%arg0: i32) -> (i32, i32) {
    %c0_i32 = arith.constant 0 : i32
    %c0_i32_0 = arith.constant 0 : i32
    %c0_i32_1 = arith.constant 0 : i32
    return %c0_i32, %c0_i32_0 : i32, i32
  }
  func.func @transform_2(%arg0: i32) -> (i32, i32) {
    %c0_i32 = arith.constant 0 : i32
    %c0_i32_0 = arith.constant 0 : i32
    %c0_i32_1 = arith.constant 0 : i32
    return %c0_i32, %c0_i32_0 : i32, i32
  }
  func.func @transform_3(%arg0: i32) -> (i32, i32) {
    %c0_i32 = arith.constant 0 : i32
    %c0_i32_0 = arith.constant 0 : i32
    %c0_i32_1 = arith.constant 0 : i32
    return %c0_i32, %c0_i32_0 : i32, i32
  }
  func.func @transform_4(%arg0: i32) -> (i32, i32) {
    %c0_i32 = arith.constant 0 : i32
    %c0_i32_0 = arith.constant 0 : i32
    return %arg0, %c0_i32 : i32, i32
  }
}

module attributes {stable_mosaic.version = 11 : i64} {
  func.func @heads_kernel(%arg0: i32, %arg1: memref<8x24xbf16, #tpu.memory_space<vmem>>, %arg2: memref<24x96xbf16, #tpu.memory_space<vmem>>, %arg3: memref<1x96xf32, #tpu.memory_space<vmem>>, %arg4: memref<96x48xbf16, #tpu.memory_space<vmem>>, %arg5: memref<1x48xf32, #tpu.memory_space<vmem>>, %arg6: memref<48x128xbf16, #tpu.memory_space<vmem>>, %arg7: memref<1x128xf32, #tpu.memory_space<vmem>>, %arg8: memref<8x128xf32, #tpu.memory_space<vmem>>) attributes {dimension_semantics = [#tpu.dimension_semantics<arbitrary>], iteration_bounds = array<i64: 1>, scalar_prefetch = 0 : i64, scratch_operands = 0 : i64, tpu.core_type = #tpu.core_type<tc>, window_params = [{pipeline_mode = #tpu.pipeline_mode<synchronous>, transform_indices = @transform_0, window_bounds = array<i64: 8, 24>}, {pipeline_mode = #tpu.pipeline_mode<synchronous>, transform_indices = @transform_1, window_bounds = array<i64: 24, 96>}, {pipeline_mode = #tpu.pipeline_mode<synchronous>, transform_indices = @transform_2, window_bounds = array<i64: 1, 96>}, {pipeline_mode = #tpu.pipeline_mode<synchronous>, transform_indices = @transform_3, window_bounds = array<i64: 96, 48>}, {pipeline_mode = #tpu.pipeline_mode<synchronous>, transform_indices = @transform_4, window_bounds = array<i64: 1, 48>}, {pipeline_mode = #tpu.pipeline_mode<synchronous>, transform_indices = @transform_5, window_bounds = array<i64: 48, 128>}, {pipeline_mode = #tpu.pipeline_mode<synchronous>, transform_indices = @transform_6, window_bounds = array<i64: 1, 128>}, {pipeline_mode = #tpu.pipeline_mode<synchronous>, transform_indices = @transform_7, window_bounds = array<i64: 8, 128>}]} {
    %c0 = arith.constant 0 : index
    %c0_0 = arith.constant 0 : index
    %0 = vector.load %arg1[%c0, %c0_0] : memref<8x24xbf16, #tpu.memory_space<vmem>>, vector<8x24xbf16>
    %c0_1 = arith.constant 0 : index
    %c0_2 = arith.constant 0 : index
    %1 = vector.load %arg2[%c0_1, %c0_2] : memref<24x96xbf16, #tpu.memory_space<vmem>>, vector<24x96xbf16>
    %cst = arith.constant dense<0.000000e+00> : vector<8x96xf32>
    %2 = tpu.matmul %0, %1, %cst {dimension_numbers = #tpu.dot_dimension_numbers<[1], [0], [0], [1], [0, 0, 1, 1], [], []>} : vector<8x24xbf16>, vector<24x96xbf16>, vector<8x96xf32> -> vector<8x96xf32>
    %c0_3 = arith.constant 0 : index
    %c0_4 = arith.constant 0 : index
    %3 = vector.load %arg3[%c0_3, %c0_4] : memref<1x96xf32, #tpu.memory_space<vmem>>, vector<1x96xf32>
    %4 = vector.broadcast %3 : vector<1x96xf32> to vector<8x96xf32>
    %5 = arith.addf %2, %4 : vector<8x96xf32>
    %cst_5 = arith.constant 0.000000e+00 : f32
    %6 = vector.broadcast %cst_5 : f32 to vector<8x96xf32>
    %7 = arith.maximumf %5, %6 : vector<8x96xf32>
    %8 = arith.truncf %7 : vector<8x96xf32> to vector<8x96xbf16>
    %c0_6 = arith.constant 0 : index
    %c0_7 = arith.constant 0 : index
    %9 = vector.load %arg4[%c0_6, %c0_7] : memref<96x48xbf16, #tpu.memory_space<vmem>>, vector<96x48xbf16>
    %cst_8 = arith.constant dense<0.000000e+00> : vector<8x48xf32>
    %10 = tpu.matmul %8, %9, %cst_8 {dimension_numbers = #tpu.dot_dimension_numbers<[1], [0], [0], [1], [0, 0, 1, 1], [], []>} : vector<8x96xbf16>, vector<96x48xbf16>, vector<8x48xf32> -> vector<8x48xf32>
    %c0_9 = arith.constant 0 : index
    %c0_10 = arith.constant 0 : index
    %11 = vector.load %arg5[%c0_9, %c0_10] : memref<1x48xf32, #tpu.memory_space<vmem>>, vector<1x48xf32>
    %12 = vector.broadcast %11 : vector<1x48xf32> to vector<8x48xf32>
    %13 = arith.addf %10, %12 : vector<8x48xf32>
    %14 = arith.truncf %13 : vector<8x48xf32> to vector<8x48xbf16>
    %c0_11 = arith.constant 0 : index
    %c0_12 = arith.constant 0 : index
    %15 = vector.load %arg6[%c0_11, %c0_12] : memref<48x128xbf16, #tpu.memory_space<vmem>>, vector<48x128xbf16>
    %cst_13 = arith.constant dense<0.000000e+00> : vector<8x128xf32>
    %16 = tpu.matmul %14, %15, %cst_13 {dimension_numbers = #tpu.dot_dimension_numbers<[1], [0], [0], [1], [0, 0, 1, 1], [], []>} : vector<8x48xbf16>, vector<48x128xbf16>, vector<8x128xf32> -> vector<8x128xf32>
    %c0_14 = arith.constant 0 : index
    %c0_15 = arith.constant 0 : index
    %17 = vector.load %arg7[%c0_14, %c0_15] : memref<1x128xf32, #tpu.memory_space<vmem>>, vector<1x128xf32>
    %18 = vector.broadcast %17 : vector<1x128xf32> to vector<8x128xf32>
    %19 = arith.addf %16, %18 : vector<8x128xf32>
    %cst_16 = arith.constant 0.000000e+00 : f32
    %20 = vector.broadcast %cst_16 : f32 to vector<8x128xf32>
    %21 = arith.subf %20, %19 : vector<8x128xf32>
    %22 = math.exp %21 : vector<8x128xf32>
    %cst_17 = arith.constant 1.000000e+00 : f32
    %23 = vector.broadcast %cst_17 : f32 to vector<8x128xf32>
    %24 = arith.addf %23, %22 : vector<8x128xf32>
    %cst_18 = arith.constant 1.000000e+00 : f32
    %25 = vector.broadcast %cst_18 : f32 to vector<8x128xf32>
    %26 = arith.divf %25, %24 : vector<8x128xf32>
    %c0_19 = arith.constant 0 : index
    %c0_20 = arith.constant 0 : index
    %27 = vector.load %arg8[%c0_19, %c0_20] : memref<8x128xf32, #tpu.memory_space<vmem>>, vector<8x128xf32>
    tpu.vector_store %arg8[%c0_19, %c0_20], %26 {strides = array<i32>} : memref<8x128xf32, #tpu.memory_space<vmem>>, vector<8x128xf32>,
    return
  }
  func.func @transform_0(%arg0: i32) -> (i32, i32) {
    %c0_i32 = arith.constant 0 : i32
    %c0_i32_0 = arith.constant 0 : i32
    %c0_i32_1 = arith.constant 0 : i32
    return %c0_i32, %c0_i32_0 : i32, i32
  }
  func.func @transform_1(%arg0: i32) -> (i32, i32) {
    %c0_i32 = arith.constant 0 : i32
    %c0_i32_0 = arith.constant 0 : i32
    %c0_i32_1 = arith.constant 0 : i32
    return %c0_i32, %c0_i32_0 : i32, i32
  }
  func.func @transform_2(%arg0: i32) -> (i32, i32) {
    %c0_i32 = arith.constant 0 : i32
    %c0_i32_0 = arith.constant 0 : i32
    %c0_i32_1 = arith.constant 0 : i32
    return %c0_i32, %c0_i32_0 : i32, i32
  }
  func.func @transform_3(%arg0: i32) -> (i32, i32) {
    %c0_i32 = arith.constant 0 : i32
    %c0_i32_0 = arith.constant 0 : i32
    %c0_i32_1 = arith.constant 0 : i32
    return %c0_i32, %c0_i32_0 : i32, i32
  }
  func.func @transform_4(%arg0: i32) -> (i32, i32) {
    %c0_i32 = arith.constant 0 : i32
    %c0_i32_0 = arith.constant 0 : i32
    %c0_i32_1 = arith.constant 0 : i32
    return %c0_i32, %c0_i32_0 : i32, i32
  }
  func.func @transform_5(%arg0: i32) -> (i32, i32) {
    %c0_i32 = arith.constant 0 : i32
    %c0_i32_0 = arith.constant 0 : i32
    %c0_i32_1 = arith.constant 0 : i32
    return %c0_i32, %c0_i32_0 : i32, i32
  }
  func.func @transform_6(%arg0: i32) -> (i32, i32) {
    %c0_i32 = arith.constant 0 : i32
    %c0_i32_0 = arith.constant 0 : i32
    %c0_i32_1 = arith.constant 0 : i32
    return %c0_i32, %c0_i32_0 : i32, i32
  }
  func.func @transform_7(%arg0: i32) -> (i32, i32) {
    %c0_i32 = arith.constant 0 : i32
    %c0_i32_0 = arith.constant 0 : i32
    %c0_i32_1 = arith.constant 0 : i32
    return %c0_i32, %c0_i32_0 : i32, i32
  }
}

</mosaic_0001>

<bundles_post_ra>
// kernel: tile.23
= control target key start
LH: loop header
LB: loop body
LE: loop exit
PB: predicated region body
PF: predicated region fallthrough
CT: control target
= control target key end

     0   :  { %s22_s0 = inlined_call_operand.vmem [shape: f32[128], index: 0, kind: input, shape index: {}]   ;;  %s23_s1 = inlined_call_operand.vmem [shape: f32[2,128], index: 1, kind: output, shape index: {}]  }
   0x1   :  { %v4_v0 = vld [vmem:[%s22_s0] ss:$0 sm:$0xff] }
   0x2   :  { %5 = vst [vmem:[%s23_s1] sm:$0x3] %v4_v0 }

// kernel: dann_1d_forward.3
= control target key start
LH: loop header
LB: loop body
LE: loop exit
PB: predicated region body
PF: predicated region fallthrough
CT: control target
= control target key end

     0   :  { %vm69_vm0 = vcmask 1044480   ;;  %v262_v1 = vmov 0   ;;  %vm56_vm1 = vcmask 80896   ;;  %v167_v8 = vlaneseq  ;;  %s376_s1 = inlined_call_operand.vmem [shape: bf16[10,256], index: 1, kind: input, shape index: {}]   ;;  %s377_s0 = inlined_call_operand.vmem [shape: bf16[64,10], index: 0, kind: input, shape index: {}]   ;;  %s378_s2 = inlined_call_operand.vmem [shape: f32[1,256], index: 2, kind: input, shape index: {}]   ;;  %s379_s3 = inlined_call_operand.vmem [shape: f32[1,256], index: 3, kind: input, shape index: {}]   ;;  %s380_s4 = inlined_call_operand.vmem [shape: f32[64,128], index: 4, kind: output, shape index: {}]  }
   0x1   :  { %v255_v0 = vld [vmem:[%s376_s1 + $0x4] ss:$8 sps:$4 sm:$0x1f]   ;;  %108 = vmatprep.mubr.bf16.mxu0 %v262_v1  ;;  %128 = vmatprep.mubr.bf16.mxu1 %v262_v1  ;;  %v257_v2 = vld [vmem:[%s376_s1] ss:$8 sps:$4 sm:$0x1f]  }
   0x2   :  { %v258_v3 = vld [vmem:[%s377_s0] sm:$0xff]   ;;  %247 = vmatprep.subr.msk.bf16.mxu0 %vm69_vm0, %v255_v0  ;;  %252 = vmatprep.subr.msk.bf16.mxu1 %vm69_vm0, %v255_v0  ;;  %v71_v4 = vsel %vm69_vm0, %v257_v2, 0  ;;  %v259_v5 = vld [vmem:[%s377_s0 + $0x10] sm:$0xff]   ;;  %v260_v6 = vld [vmem:[%s377_s0 + $0x8] sm:$0xff]   ;;  %v168_v9 = vshrl.u32 %v167_v8, 7 }
   0x3   :  { %77 = vmatpush1.bf16.msra.mxu0 %v71_v4  ;;  %253 = vmatpush1.bf16.msra.mxu1 %v71_v4  ;;  %v261_v7 = vld [vmem:[%s377_s0 + $0x18] sm:$0xff]   ;;  %v165_v11 = vld [vmem:[%s378_s2] sm:$0x3] }
   0x4   :  { %v169_v10 = vsub.s32 0, %v168_v9  ;;  %v173_v12 = vsub.s32 1, %v168_v9  ;;  %v193_v13 = vld [vmem:[%s379_s3] sm:$0x3] }
   0x6   :  { %248 = vmatmul.mubr.msk.bf16.vlgmr.msra.gmra.mrb[0].mxu0 %vm56_vm1, %v258_v3  ;;  %250 = vmatmul.mubr.msk.bf16.vlgmr.msra.gmra.mrb[0].mxu1 %vm56_vm1, %v259_v5  ;;  %v312_v14 = vrot.slane %v165_v11, %v169_v10  ;;  %v314_v17 = vrot.slane %v165_v11, %v173_v12  ;;  %v316_v19 = vrot.slane %v193_v13, %v169_v10 }
   0x7   :  { %118 = vmatprep.mubr.bf16.mxu0 %v262_v1  ;;  %138 = vmatprep.mubr.bf16.mxu1 %v262_v1  ;;  %v318_v24 = vrot.slane %v193_v13, %v173_v12 }
   0xe   :  { %249 = vmatmul.mubr.msk.bf16.gmra.mrb[4].mxu0 %vm56_vm1, %v260_v6  ;;  %251 = vmatmul.mubr.msk.bf16.gmra.mrb[4].mxu1 %vm56_vm1, %v261_v7 }
  0xd9   :  { %v110_v15 = vpop.f32.mrb[0].mxu0  ;;  %v130_v16 = vpop.f32.mrb[0].mxu1 }
  0xda   :  { %v149_v18 = vmax.f32 %v110_v15, 0.0  ;;  %v157_v20 = vmax.f32 %v130_v16, 0.0  ;;  %v112_v21 = vpop.f32.mrb[1].mxu0  ;;  %v132_v22 = vpop.f32.mrb[1].mxu1 }
  0xdb   :  { %v150_v23 = vmax.f32 %v112_v21, 0.0  ;;  %v158_v25 = vmax.f32 %v132_v22, 0.0  ;;  %v114_v26 = vpop.f32.mrb[2].mxu0  ;;  %v134_v27 = vpop.f32.mrb[2].mxu1 }
  0xdc   :  { %v177_v28 = vmul.f32 %v312_v14, %v149_v18  ;;  %v185_v29 = vmul.f32 %v312_v14, %v157_v20  ;;  %v151_v30 = vmax.f32 %v114_v26, 0.0  ;;  %v159_v31 = vmax.f32 %v134_v27, 0.0  ;;  %v116_v32 = vpop.f32.mrb[3].mxu0  ;;  %v136_v33 = vpop.f32.mrb[3].mxu1 }
  0xdd   :  { %v178_v34 = vmul.f32 %v314_v17, %v150_v23  ;;  %v186_v35 = vmul.f32 %v314_v17, %v158_v25  ;;  %v152_v36 = vmax.f32 %v116_v32, 0.0  ;;  %v160_v37 = vmax.f32 %v136_v33, 0.0 }
  0xde   :  { %v205_v38 = vadd.f32 %v316_v19, %v177_v28  ;;  %v213_v39 = vadd.f32 %v316_v19, %v185_v29  ;;  %v179_v40 = vmul.f32 %v312_v14, %v151_v30  ;;  %v187_v41 = vmul.f32 %v312_v14, %v159_v31 }
  0xdf   :  { %v206_v42 = vadd.f32 %v318_v24, %v178_v34  ;;  %v214_v43 = vadd.f32 %v318_v24, %v186_v35  ;;  %v180_v44 = vmul.f32 %v314_v17, %v152_v36  ;;  %v188_v45 = vmul.f32 %v314_v17, %v160_v37 }
  0xe0   :  { %v207_v46 = vadd.f32 %v316_v19, %v179_v40  ;;  %v215_v47 = vadd.f32 %v316_v19, %v187_v41 }
  0xe1   :  { %v221_v48 = vmax.f32 %v205_v38, %v206_v42  ;;  %v225_v49 = vmax.f32 %v213_v39, %v214_v43  ;;  %v208_v50 = vadd.f32 %v318_v24, %v180_v44  ;;  %v216_v51 = vadd.f32 %v318_v24, %v188_v45  ;;  %v120_v52 = vpop.f32.mrb[4].mxu0  ;;  %v140_v53 = vpop.f32.mrb[4].mxu1 }
  0xe2   :  { %v153_v54 = vmax.f32 %v120_v52, 0.0  ;;  %v161_v55 = vmax.f32 %v140_v53, 0.0  ;;  %v122_v56 = vpop.f32.mrb[5].mxu0  ;;  %v142_v57 = vpop.f32.mrb[5].mxu1 }
  0xe3   :  { %229 = vst [vmem:[%s380_s4] sm:$0xff] %v221_v48  ;;  %233 = vst [vmem:[%s380_s4 + $0x20] sm:$0xff] %v225_v49  ;;  %v222_v58 = vmax.f32 %v207_v46, %v208_v50  ;;  %v226_v59 = vmax.f32 %v215_v47, %v216_v51  ;;  %v154_v60 = vmax.f32 %v122_v56, 0.0  ;;  %v162_v61 = vmax.f32 %v142_v57, 0.0  ;;  %v124_v62 = vpop.f32.mrb[6].mxu0  ;;  %v144_v63 = vpop.f32.mrb[6].mxu1 }
  0xe4   :  { %v181_v0 = vmul.f32 %v312_v14, %v153_v54  ;;  %v189_v1 = vmul.f32 %v312_v14, %v161_v55  ;;  %v155_v2 = vmax.f32 %v124_v62, 0.0  ;;  %v163_v3 = vmax.f32 %v144_v63, 0.0  ;;  %v126_v4 = vpop.f32.mrb[7].mxu0  ;;  %v146_v5 = vpop.f32.mrb[7].mxu1 }
  0xe5   :  { %230 = vst [vmem:[%s380_s4 + $0x8] sm:$0xff] %v222_v58  ;;  %234 = vst [vmem:[%s380_s4 + $0x28] sm:$0xff] %v226_v59  ;;  %v182_v6 = vmul.f32 %v314_v17, %v154_v60  ;;  %v190_v7 = vmul.f32 %v314_v17, %v162_v61  ;;  %v156_v8 = vmax.f32 %v126_v4, 0.0  ;;  %v164_v9 = vmax.f32 %v146_v5, 0.0 }
  0xe6   :  { %v209_v10 = vadd.f32 %v316_v19, %v181_v0  ;;  %v217_v11 = vadd.f32 %v316_v19, %v189_v1  ;;  %v183_v12 = vmul.f32 %v312_v14, %v155_v2  ;;  %v191_v13 = vmul.f32 %v312_v14, %v163_v3 }
  0xe7   :  { %v210_v15 = vadd.f32 %v318_v24, %v182_v6  ;;  %v218_v16 = vadd.f32 %v318_v24, %v190_v7  ;;  %v184_v18 = vmul.f32 %v314_v17, %v156_v8  ;;  %v192_v20 = vmul.f32 %v314_v17, %v164_v9 }
  0xe8   :  { %v211_v21 = vadd.f32 %v316_v19, %v183_v12  ;;  %v219_v22 = vadd.f32 %v316_v19, %v191_v13 }
  0xe9   :  { %v223_v23 = vmax.f32 %v209_v10, %v210_v15  ;;  %v227_v25 = vmax.f32 %v217_v11, %v218_v16  ;;  %v212_v26 = vadd.f32 %v318_v24, %v184_v18  ;;  %v220_v27 = vadd.f32 %v318_v24, %v192_v20 }
  0xeb   :  { %231 = vst [vmem:[%s380_s4 + $0x10] sm:$0xff] %v223_v23  ;;  %235 = vst [vmem:[%s380_s4 + $0x30] sm:$0xff] %v227_v25  ;;  %v224_v14 = vmax.f32 %v211_v21, %v212_v26  ;;  %v228_v17 = vmax.f32 %v219_v22, %v220_v27 }
  0xed   :  { %232 = vst [vmem:[%s380_s4 + $0x18] sm:$0xff] %v224_v14  ;;  %236 = vst [vmem:[%s380_s4 + $0x38] sm:$0xff] %v228_v17 }

// kernel: dann_1d_forward.4
= control target key start
LH: loop header
LB: loop body
LE: loop exit
PB: predicated region body
PF: predicated region fallthrough
CT: control target
= control target key end

     0   :  { %v155_v1 = vmov 0   ;;  %vm47_vm0 = vcmask 1043456   ;;  %vm43_vm1 = vcmask 195584   ;;  %v103_v8 = vlaneseq  ;;  %s205_s1 = inlined_call_operand.vmem [shape: bf16[24,256], index: 1, kind: input, shape index: {}]   ;;  %s206_s0 = inlined_call_operand.vmem [shape: bf16[16,24], index: 0, kind: input, shape index: {}]   ;;  %s207_s2 = inlined_call_operand.vmem [shape: f32[1,256], index: 2, kind: input, shape index: {}]   ;;  %s208_s3 = inlined_call_operand.vmem [shape: f32[1,256], index: 3, kind: input, shape index: {}]   ;;  %s209_s4 = inlined_call_operand.vmem [shape: f32[16,128], index: 4, kind: output, shape index: {}]  }
   0x1   :  { %v22_v0 = vld [vmem:[%s205_s1 + $0x10] sm:$0xff]  ;;  %86 = vmatprep.mubr.bf16.mxu0 %v155_v1  ;;  %v149_v2 = vld [vmem:[%s205_s1 + $0x4] ss:$8 sps:$4 sm:$0xff]   ;;  %v152_v4 = vld [vmem:[%s205_s1] ss:$8 sps:$4 sm:$0xff]  }
   0x2   :  { %v145_v3 = vcombine.high %v22_v0, %v22_v0  ;;  %v144_v5 = vcombine.low %v22_v0, %v22_v0  ;;  %54 = vmatprep.subr.bf16.mxu0 %v149_v2  ;;  %v154_v7 = vld [vmem:[%s206_s0] sm:$0xff]   ;;  %v104_v9 = vshrl.u32 %v103_v8, 7 }
   0x3   :  { %55 = vmatpush1.bf16.msra.mxu0 %v152_v4  ;;  %v101_v11 = vld [vmem:[%s207_s2] sm:$0x3] }
   0x4   :  { %146 = vmatprep.subr.msk.bf16.mxu0 %vm47_vm0, %v145_v3  ;;  %v49_v6 = vsel %vm47_vm0, %v144_v5, 0  ;;  %v105_v10 = vsub.s32 0, %v104_v9  ;;  %v109_v12 = vsub.s32 1, %v104_v9  ;;  %v117_v13 = vld [vmem:[%s208_s3] sm:$0x3] }
   0x6   :  { %v106_v14 = vrot.slane %v101_v11, %v105_v10  ;;  %v110_v16 = vrot.slane %v101_v11, %v109_v12  ;;  %v122_v18 = vrot.slane %v117_v13, %v105_v10  ;;  %v126_v21 = vrot.slane %v117_v13, %v109_v12 }
   0x7   :  { %57 = vmatpush1.bf16.msra.mxu0 %v49_v6 }
   0xa   :  { %147 = vmatmul.mubr.msk.bf16.vlgmr.msra.gmra.mrb[0].mxu0 %vm43_vm1, %v154_v7 }
  0xdd   :  { %v88_v15 = vpop.f32.mrb[0].mxu0 }
  0xde   :  { %v97_v17 = vmax.f32 %v88_v15, 0.0  ;;  %v90_v19 = vpop.f32.mrb[1].mxu0 }
  0xdf   :  { %v98_v20 = vmax.f32 %v90_v19, 0.0  ;;  %v92_v22 = vpop.f32.mrb[2].mxu0 }
  0xe0   :  { %v113_v23 = vmul.f32 %v106_v14, %v97_v17  ;;  %v99_v24 = vmax.f32 %v92_v22, 0.0  ;;  %v94_v25 = vpop.f32.mrb[3].mxu0 }
  0xe1   :  { %v114_v26 = vmul.f32 %v110_v16, %v98_v20  ;;  %v100_v27 = vmax.f32 %v94_v25, 0.0 }
  0xe2   :  { %v129_v28 = vadd.f32 %v122_v18, %v113_v23  ;;  %v115_v29 = vmul.f32 %v106_v14, %v99_v24 }
  0xe3   :  { %v130_v30 = vadd.f32 %v126_v21, %v114_v26  ;;  %v116_v31 = vmul.f32 %v110_v16, %v100_v27 }
  0xe4   :  { %v131_v32 = vadd.f32 %v122_v18, %v115_v29 }
  0xe5   :  { %v133_v33 = vmax.f32 %v129_v28, %v130_v30  ;;  %v132_v34 = vadd.f32 %v126_v21, %v116_v31 }
  0xe7   :  { %135 = vst [vmem:[%s209_s4] sm:$0xff] %v133_v33  ;;  %v134_v35 = vmax.f32 %v131_v32, %v132_v34 }
  0xe9   :  { %136 = vst [vmem:[%s209_s4 + $0x8] sm:$0xff] %v134_v35 }

// kernel: dann_1d_forward.5
= control target key start
LH: loop header
LB: loop body
LE: loop exit
PB: predicated region body
PF: predicated region fallthrough
CT: control target
= control target key end

     0   :  { %v365_v0 = vmov 0.0   ;;  %vm51_vm0 = vcmask 1043456   ;;  %vm366_vm1 = vmmov 0   ;;  %vm47_vm2 = vcmask 195584   ;;  %s458_s1 = inlined_call_operand.vmem [shape: bf16[24,96], index: 1, kind: input, shape index: {}]   ;;  %s459_s3 = inlined_call_operand.vmem [shape: bf16[96,48], index: 3, kind: input, shape index: {}]   ;;  %s460_s0 = inlined_call_operand.vmem [shape: bf16[8,24], index: 0, kind: input, shape index: {}]   ;;  %s461_s5 = inlined_call_operand.vmem [shape: bf16[48,128], index: 5, kind: input, shape index: {}]   ;;  %s462_s2 = inlined_call_operand.vmem [shape: f32[1,96], index: 2, kind: input, shape index: {}]   ;;  %s463_s4 = inlined_call_operand.vmem [shape: f32[1,48], index: 4, kind: input, shape index: {}]   ;;  %s464_s6 = inlined_call_operand.vmem [shape: f32[1,128], index: 6, kind: input, shape index: {}]   ;;  %s465_s7 = inlined_call_operand.vmem [shape: f32[8,128], index: 7, kind: output, shape index: {}]  }
   0x1   :  { %314 = vmatprep.subr.bf16.mxu0 %v365_v0  ;;  %v350_v1 = vld [vmem:[%s458_s1] sm:$0xff]   ;;  %318 = vmatprep.mubr.msk.bf16.mxu0 %vm366_vm1, %v365_v0  ;;  %v351_v2 = vld [vmem:[%s458_s1 + $0x8] ss:$0 sps:$4 sm:$0xff]   ;;  %v354_v7 = vld [vmem:[%s459_s3 + $0x10] sm:$0xff]   ;;  %vm152_vm3 = vcmask 785408   ;;  %vm228_vm4 = vcmask 392192  }
   0x2   :  { %322 = vmatprep.subr.bf16.mxu1 %v365_v0  ;;  %334 = vmatprep.mubr.msk.bf16.mxu1 %vm366_vm1, %v365_v0  ;;  %v352_v3 = vld [vmem:[%s459_s3] sm:$0xff]   ;;  %v53_v4 = vsel %vm51_vm0, %v351_v2, 0  ;;  %v353_v5 = vld [vmem:[%s459_s3 + $0x8] sm:$0xff]   ;;  %v355_v8 = vld [vmem:[%s459_s3 + $0x18] sm:$0xff]  }
   0x3   :  { %315 = vmatpush3.bf16.msra.mxu0 %v350_v1  ;;  %323 = vmatpush3.bf16.msra.mxu1 %v352_v3  ;;  %v27_v6 = vld [vmem:[%s460_s0] sm:$0xf]  ;;  %v357_v10 = vld [vmem:[%s459_s3 + $0x28] sm:$0xff]   ;;  %v360_v21 = vld [vmem:[%s461_s5 + $0x10] sm:$0xff]  }
   0x4   :  { %316 = vmatprep.subr.bf16.mxu0 %v365_v0  ;;  %324 = vmatprep.subr.bf16.mxu1 %v365_v0  ;;  %v356_v9 = vld [vmem:[%s459_s3 + $0x20] sm:$0xff]   ;;  %v359_v12 = vld [vmem:[%s461_s5 + $0x8] sm:$0xff]  }
   0x5   :  { %v358_v11 = vld [vmem:[%s461_s5] sm:$0xff]  }
   0x6   :  { %v283_v13 = vld [vmem:[%s462_s2] ss:$0 sm:$0xff] }
   0x7   :  { %317 = vmatpush3.bf16.msra.mxu0 %v53_v4  ;;  %325 = vmatpush3.bf16.msra.mxu1 %v353_v5  ;;  %v287_v22 = vld [vmem:[%s463_s4] ss:$0 sm:$0xff] }
   0x8   :  { %338 = vmatprep.subr.bf16.mxu0 %v365_v0  ;;  %326 = vmatprep.subr.bf16.mxu1 %v365_v0  ;;  %v295_v29 = vld [vmem:[%s464_s6] ss:$0 sm:$0xff] }
   0xa   :  { %319 = vmatmul.mubr.msk.bf16.vlgmr.msra.gmra.mrb[0].mxu0 %vm47_vm2, %v27_v6 }
   0xb   :  { %344 = vmatprep.mubr.msk.bf16.mxu0 %vm366_vm1, %v365_v0  ;;  %327 = vmatpush3.bf16.msra.mxu1 %v354_v7 }
   0xc   :  { %328 = vmatprep.subr.bf16.mxu1 %v365_v0  ;;  %339 = vmatpush3.bf16.msra.mxu0 %v358_v11 }
   0xd   :  { %340 = vmatprep.subr.bf16.mxu0 %v365_v0 }
   0xf   :  { %329 = vmatpush3.bf16.msra.mxu1 %v355_v8 }
  0x10   :  { %330 = vmatprep.subr.bf16.mxu1 %v365_v0  ;;  %341 = vmatpush3.bf16.msra.mxu0 %v359_v12 }
  0x11   :  { %342 = vmatprep.subr.bf16.mxu0 %v365_v0 }
  0x13   :  { %331 = vmatpush3.bf16.msra.mxu1 %v356_v9 }
  0x14   :  { %332 = vmatprep.subr.bf16.mxu1 %v365_v0  ;;  %343 = vmatpush3.bf16.msra.mxu0 %v360_v21 }
  0x17   :  { %333 = vmatpush3.bf16.msra.mxu1 %v357_v10 }
  0xdd   :  { %v89_v14 = vpop.f32.mrb[0].mxu0 }
  0xde   :  { %v90_v15 = vadd.f32 %v283_v13, %v89_v14  ;;  %v320_v16 = vpop.f32.mrb[1].mxu0 }
  0xdf   :  { %v92_v17 = vpop.f32.mrb[2].mxu0 }
  0xe0   :  { %v95_v18 = vmax.f32 %v90_v15, 0.0  ;;  %v321_v19 = vpop.f32.mrb[3].mxu0 }
  0xe2   :  { %v96_v20 = vpack.c.bf16 %v95_v18, %v95_v18 }
  0xe4   :  { %335 = vmatmul.mubr.msk.bf16.vlgmr.msra.gmra.mrb[0].mxu1 %vm152_vm3, %v96_v20 }
 0x1b7   :  { %v190_v23 = vpop.f32.mrb[0].mxu1 }
 0x1b8   :  { %v191_v24 = vadd.f32 %v287_v22, %v190_v23  ;;  %v336_v25 = vpop.f32.mrb[1].mxu1 }
 0x1b9   :  { %v193_v26 = vpop.f32.mrb[2].mxu1 }
 0x1ba   :  { %v196_v27 = vpack.c.bf16 %v191_v24, %v191_v24  ;;  %v337_v28 = vpop.f32.mrb[3].mxu1 }
 0x1bc   :  { %345 = vmatmul.mubr.msk.bf16.vlgmr.msra.gmra.mrb[4].mxu0 %vm228_vm4, %v196_v27 }
 0x28f   :  { %v266_v30 = vpop.f32.mrb[4].mxu0 }
 0x290   :  { %v267_v31 = vadd.f32 %v295_v29, %v266_v30  ;;  %v346_v32 = vpop.f32.mrb[5].mxu0 }
 0x291   :  { %v269_v33 = vpop.f32.mrb[6].mxu0 }
 0x292   :  { %v272_v34 = vsub.f32 0.0, %v267_v31  ;;  %v347_v35 = vpop.f32.mrb[7].mxu0 }
 0x294   :  { %v273_v36 = vmul.f32 1.442695, %v272_v34 }
 0x296   :  { %361 = vpow2.f32 %v273_v36 }
 0x2a0   :  { %v362_v37 = vpop.eup %361 }
 0x2a1   :  { %v275_v38 = vadd.f32 1.0, %v362_v37 }
 0x2a3   :  { %363 = vrcp.f32 %v275_v38 }
 0x2ad   :  { %v364_v39 = vpop.eup %363 }
 0x2ae   :  { %278 = vst [vmem:[%s465_s7] sm:$0xff] %v364_v39 }

</bundles_post_ra>
